<compile_context>
chip_gen: v5e
topology: v5e:2x2
jax: 0.10.0
libtpu: 0.0.40
codegen_flags: <defaults>
</compile_context>

<pallas_src>
import numpy as np
import jax
import jax.numpy as jnp
from jax.experimental import pallas as pl
from jax.experimental.pallas import tpu as pltpu


_TM_MAX = 512
_TN_MAX = 512
_TK_MAX = 1024


def _round_up(x: int, m: int) -> int:
    return (x + m - 1) // m * m


def _pick_k_tile(K: int):
    """Pick tk so that it divides the (possibly padded) K; prefer no K pad."""
    if K <= _TK_MAX:
        return K, K  # single K block equal to the full dim -> no padding
    if K % 128 == 0:
        for tk in range(_TK_MAX, 0, -128):
            if K % tk == 0:
                return tk, K
    Kp = _round_up(K, 128)
    for tk in range(_TK_MAX, 0, -128):
        if Kp % tk == 0:
            return tk, Kp
    return 128, Kp


def _pick_n_tile(Np: int):
    """Largest multiple-of-128 tile <= _TN_MAX dividing the padded N."""
    tn = min(_TN_MAX, Np)
    while Np % tn != 0:
        tn -= 128
    return tn


def _pick_m_tile(M: int, align: int):
    """Pick tm minimizing M padding; single block when the whole M fits."""
    Mp0 = _round_up(M, align)
    if Mp0 <= _TM_MAX:
        return Mp0, Mp0
    best_tm, best_mp = None, None
    for tm in (512, 384, 256, 128):
        mp = _round_up(M, tm)
        if best_mp is None or mp < best_mp:
            best_tm, best_mp = tm, mp
    return best_tm, best_mp


def _matmul_bias_kernel_out_acc(x_ref, w_ref, b_ref, o_ref):
    """f32 output: accumulate directly into the resident output block.

    Grid = (M/tm, N/tn, K/tk); the output block index ignores the K axis, so
    o_ref stays resident in VMEM across the reduction. Bias is folded into the
    k==0 init, so the last step has no epilogue work.
    """
    k = pl.program_id(2)

    @pl.when(k == 0)
    def _():
        o_ref[...] = jnp.zeros_like(o_ref) + b_ref[...].astype(o_ref.dtype)

    o_ref[...] += jnp.dot(
        x_ref[...], w_ref[...], preferred_element_type=jnp.float32
    )


def _matmul_bias_kernel_scratch_acc(x_ref, w_ref, b_ref, o_ref, acc_ref):
    """Non-f32 output: f32 scratch accumulator, one cast at the last K step."""
    k = pl.program_id(2)

    @pl.when(k == 0)
    def _():
        acc_ref[...] = jnp.zeros_like(acc_ref) + b_ref[...].astype(jnp.float32)

    acc_ref[...] += jnp.dot(
        x_ref[...], w_ref[...], preferred_element_type=jnp.float32
    )

    @pl.when(k == pl.num_programs(2) - 1)
    def _():
        o_ref[...] = acc_ref[...].astype(o_ref.dtype)


class PallasLinearEmbedder:
    """Inner module: (batch, n_channels, n_times) -> (batch, out_size).

    y = flatten(x) @ w + b, with the matmul as a tiled Pallas kernel.
    Parameter padding / layout is done once at construction time.
    """

    def __init__(self, w, b, *, use_bf16=False, allow_xla_fast_path=True):
        K, N = w.shape
        self.k = int(K)
        self.n = int(N)
        self.use_bf16 = bool(use_bf16)
        self.allow_xla_fast_path = bool(allow_xla_fast_path)

        self.tk, self.k_pad = _pick_k_tile(self.k)
        self.n_pad = _round_up(self.n, 128)          # lane-dense output
        self.tn = _pick_n_tile(self.n_pad)

        w_dtype = jnp.bfloat16 if self.use_bf16 else w.dtype
        # Pad parameters ONCE (zero K rows contribute nothing to the dot;
        # padded N columns are sliced off after the kernel).
        self.wp = jnp.pad(
            w, ((0, self.k_pad - self.k), (0, self.n_pad - self.n))
        ).astype(w_dtype)
        self.bp = jnp.pad(b, (0, self.n_pad - self.n)).reshape(
            1, self.n_pad
        ).astype(jnp.float32)

    def _pallas_matmul(self, x2d):
        M, K = x2d.shape
        assert K == self.k, (K, self.k)
        out_dtype = x2d.dtype

        Kp, Np, tk, tn = self.k_pad, self.n_pad, self.tk, self.tn
        align = 16 if self.use_bf16 else 8
        tm, Mp = _pick_m_tile(M, align)

        # v7x megacore: if the (i, j) parallel grid degenerates to a single
        # block, split M in half so both TensorCores get work.
        if (Mp // tm) * (Np // tn) == 1 and Mp >= 256 and (Mp // 2) % align == 0:
            tm = Mp // 2

        xp = x2d
        if Mp != M or Kp != K:
            xp = jnp.pad(x2d, ((0, Mp - M), (0, Kp - K)))
        if self.use_bf16:
            xp = xp.astype(jnp.bfloat16)

        grid = (Mp // tm, Np // tn, Kp // tk)

        if out_dtype == jnp.float32:
            kernel = _matmul_bias_kernel_out_acc
            scratch_shapes = []
        else:
            kernel = _matmul_bias_kernel_scratch_acc
            scratch_shapes = [pltpu.VMEM((tm, tn), jnp.float32)]

        out = pl.pallas_call(
            kernel,
            out_shape=jax.ShapeDtypeStruct((Mp, Np), out_dtype),
            grid_spec=pltpu.PrefetchScalarGridSpec(
                num_scalar_prefetch=0,
                grid=grid,
                in_specs=[
                    pl.BlockSpec((tm, tk), lambda i, j, k: (i, k)),   # x tile
                    pl.BlockSpec((tk, tn), lambda i, j, k: (k, j)),   # w tile
                    pl.BlockSpec((1, tn), lambda i, j, k: (0, j)),    # bias row
                ],
                out_specs=pl.BlockSpec((tm, tn), lambda i, j, k: (i, j)),
                scratch_shapes=scratch_shapes,
            ),
            compiler_params=pltpu.CompilerParams(
                dimension_semantics=("parallel", "parallel", "arbitrary"),
                vmem_limit_bytes=32 * 1024 * 1024,
            ),
        )(xp, self.wp, self.bp)

        if Mp != M or Np != self.n:
            out = out[:M, : self.n]
        return out

    def __call__(self, x):
        n, c, t = x.shape
        x2d = x.reshape(n, c * t)

        # Tiny-problem fast path: single-tile matmuls are dominated by launch
        # overhead and the output slice; let XLA's fused dot handle them.
        if (
            self.allow_xla_fast_path
            and n <= 128
            and self.n_pad <= _TN_MAX
            and self.k_pad == self.tk
        ):
            y = jnp.dot(
                x2d,
                self.wp[: self.k, : self.n],
                preferred_element_type=jnp.float32,
            ) + self.bp[0, : self.n]
            return y.astype(x2d.dtype)

        return self._pallas_matmul(x2d)


class TimeDistributed:
    """JAX/Pallas equivalent of braindecode's TimeDistributed.forward."""

    # TODO(synk): the wrapped `module` is arbitrary in the PyTorch spec; any
    # callable taking (batch, n_channels, n_times) works here. A Pallas-backed
    # linear embedder is provided as the concrete example module.
    def __init__(self, module):
        self.module = module

    def __call__(self, x):
        b, s, c, t = x.shape
        out = self.module(x.reshape(b * s, c, t))
        return out.reshape(b, s, -1)


if __name__ == "__main__":
    key = jax.random.PRNGKey(0)
    k1, k2, k3, k4, k5, k6 = jax.random.split(key, 6)

    # --- primary check: small shapes from the module spec -------------------
    B, S, C, T, OUT = 2, 8, 4, 16, 32
    x = jax.random.normal(k1, (B, S, C, T), dtype=jnp.float32)
    w = jax.random.normal(k2, (C * T, OUT), dtype=jnp.float32) * 0.1
    b = jax.random.normal(k3, (OUT,), dtype=jnp.float32) * 0.1

    # Disable the XLA tiny-problem fast path so the Pallas kernel itself runs.
    td = TimeDistributed(PallasLinearEmbedder(w, b, allow_xla_fast_path=False))
    y = jax.block_until_ready(td(x))
    assert y.shape == (B, S, OUT), y.shape

    ref = (
        np.asarray(x).reshape(B * S, C * T).astype(np.float64)
        @ np.asarray(w).astype(np.float64)
        + np.asarray(b).astype(np.float64)
    ).reshape(B, S, OUT)
    np.testing.assert_allclose(np.asarray(y), ref, rtol=1e-4, atol=1e-4)

    # --- secondary check: multi-block grid, no activation padding needed ----
    B2, S2, C2, T2, OUT2 = 4, 160, 8, 128, 200  # M=640, K=1024, N=200
    x2 = jax.random.normal(k4, (B2, S2, C2, T2), dtype=jnp.float32)
    w2 = jax.random.normal(k5, (C2 * T2, OUT2), dtype=jnp.float32) * 0.05
    b2 = jax.random.normal(k6, (OUT2,), dtype=jnp.float32) * 0.05

    td2 = TimeDistributed(PallasLinearEmbedder(w2, b2))
    y2 = jax.block_until_ready(td2(x2))
    assert y2.shape == (B2, S2, OUT2), y2.shape

    ref2 = (
        np.asarray(x2).reshape(B2 * S2, C2 * T2).astype(np.float64)
        @ np.asarray(w2).astype(np.float64)
        + np.asarray(b2).astype(np.float64)
    ).reshape(B2, S2, OUT2)
    np.testing.assert_allclose(np.asarray(y2), ref2, rtol=2e-3, atol=2e-3)

    print("KERNEL_OK")
</pallas_src>

<mosaic_0001>
module attributes {stable_mosaic.version = 11 : i64} {
  func.func @_matmul_bias_kernel_out_acc(%arg0: i32, %arg1: i32, %arg2: i32, %arg3: memref<16x64xf32, #tpu.memory_space<vmem>>, %arg4: memref<64x128xf32, #tpu.memory_space<vmem>>, %arg5: memref<1x128xf32, #tpu.memory_space<vmem>>, %arg6: memref<16x128xf32, #tpu.memory_space<vmem>>) attributes {dimension_semantics = [#tpu.dimension_semantics<parallel>, #tpu.dimension_semantics<parallel>, #tpu.dimension_semantics<arbitrary>], iteration_bounds = array<i64: 1, 1, 1>, scalar_prefetch = 0 : i64, scratch_operands = 0 : i64, tpu.core_type = #tpu.core_type<tc>, window_params = [{transform_indices = @transform_0, window_bounds = array<i64: 16, 64>}, {transform_indices = @transform_1, window_bounds = array<i64: 64, 128>}, {transform_indices = @transform_2, window_bounds = array<i64: 1, 128>}, {transform_indices = @transform_3, window_bounds = array<i64: 16, 128>}]} {
    %c0_i32 = arith.constant 0 : i32
    %0 = arith.cmpi eq, %arg2, %c0_i32 : i32
    %1 = arith.extui %0 : i1 to i32
    %c0_i32_0 = arith.constant 0 : i32
    %2 = arith.cmpi ne, %1, %c0_i32_0 : i32
    scf.if %2 {
      %cst_8 = arith.constant 0.000000e+00 : f32
      %9 = vector.broadcast %cst_8 : f32 to vector<16x128xf32>
      %c0_9 = arith.constant 0 : index
      %c0_10 = arith.constant 0 : index
      %10 = vector.load %arg5[%c0_9, %c0_10] : memref<1x128xf32, #tpu.memory_space<vmem>>, vector<1x128xf32>
      %11 = vector.broadcast %10 : vector<1x128xf32> to vector<16x128xf32>
      %12 = arith.addf %9, %11 : vector<16x128xf32>
      %c0_11 = arith.constant 0 : index
      %c0_12 = arith.constant 0 : index
      %13 = vector.load %arg6[%c0_11, %c0_12] : memref<16x128xf32, #tpu.memory_space<vmem>>, vector<16x128xf32>
      tpu.vector_store %arg6[%c0_11, %c0_12], %12 {strides = array<i32>} : memref<16x128xf32, #tpu.memory_space<vmem>>, vector<16x128xf32>,
    } else {
    }
    %c0 = arith.constant 0 : index
    %c0_1 = arith.constant 0 : index
    %3 = vector.load %arg6[%c0, %c0_1] : memref<16x128xf32, #tpu.memory_space<vmem>>, vector<16x128xf32>
    %c0_2 = arith.constant 0 : index
    %c0_3 = arith.constant 0 : index
    %4 = vector.load %arg3[%c0_2, %c0_3] : memref<16x64xf32, #tpu.memory_space<vmem>>, vector<16x64xf32>
    %c0_4 = arith.constant 0 : index
    %c0_5 = arith.constant 0 : index
    %5 = vector.load %arg4[%c0_4, %c0_5] : memref<64x128xf32, #tpu.memory_space<vmem>>, vector<64x128xf32>
    %cst = arith.constant dense<0.000000e+00> : vector<16x128xf32>
    %6 = tpu.matmul %4, %5, %cst {dimension_numbers = #tpu.dot_dimension_numbers<[1], [0], [0], [1], [0, 0, 1, 1], [], []>} : vector<16x64xf32>, vector<64x128xf32>, vector<16x128xf32> -> vector<16x128xf32>
    %7 = arith.addf %3, %6 : vector<16x128xf32>
    %c0_6 = arith.constant 0 : index
    %c0_7 = arith.constant 0 : index
    %8 = vector.load %arg6[%c0_6, %c0_7] : memref<16x128xf32, #tpu.memory_space<vmem>>, vector<16x128xf32>
    tpu.vector_store %arg6[%c0_6, %c0_7], %7 {strides = array<i32>} : memref<16x128xf32, #tpu.memory_space<vmem>>, vector<16x128xf32>,
    return
  }
  func.func @transform_0(%arg0: i32, %arg1: i32, %arg2: i32) -> (i32, i32) {
    %c0_i32 = arith.constant 0 : i32
    return %arg0, %arg2 : i32, i32
  }
  func.func @transform_1(%arg0: i32, %arg1: i32, %arg2: i32) -> (i32, i32) {
    %c0_i32 = arith.constant 0 : i32
    return %arg2, %arg1 : i32, i32
  }
  func.func @transform_2(%arg0: i32, %arg1: i32, %arg2: i32) -> (i32, i32) {
    %c0_i32 = arith.constant 0 : i32
    %c0_i32_0 = arith.constant 0 : i32
    return %c0_i32, %arg1 : i32, i32
  }
  func.func @transform_3(%arg0: i32, %arg1: i32, %arg2: i32) -> (i32, i32) {
    %c0_i32 = arith.constant 0 : i32
    return %arg0, %arg1 : i32, i32
  }
}

</mosaic_0001>

<bundles_post_ra>
// kernel: tpu_custom_call.1
= control target key start
LH: loop header
LB: loop body
LE: loop exit
PB: predicated region body
PF: predicated region fallthrough
CT: control target
= control target key end

     0   :  { %8 = vsyncpa [#allocation3], 0  ;;  %s264_s0 = inlined_call_operand.hbm [shape: f32[16,64], index: 0, kind: input, shape index: {}]   ;;  %s265_s1 = inlined_call_operand.hbm [shape: f32[64,128], index: 1, kind: input, shape index: {}]   ;;  %s266_s2 = inlined_call_operand.vmem [shape: f32[1,128], index: 2, kind: input, shape index: {}]   ;;  %s267_s3 = inlined_call_operand.hbm [shape: f32[16,128], index: 3, kind: output, shape index: {}]  }
   0x1   :  { %9 = vsyncpa [#allocation6], 0 }
   0x2   :  { %10 = vsyncpa [#allocation4], 0  ;;  %s15_s14 = sshll.u32 %s264_s0, 4  ;;  %s218_s15 = smov [#allocation2]   ;;  %s16_s14 = int_to_ptr.hbm [resolvable:$true] %s15_s14 }
   0x3   :  { %s17_s16 = sshll.u32 %s218_s15, 4  ;;  %s28_s19 = sshll.u32 %s265_s1, 4  ;;  %s18_s16 = int_to_ptr.vmem [resolvable:$true] %s17_s16  ;;  %s29_s19 = int_to_ptr.hbm [resolvable:$true] %s28_s19 }
   0x4   :  { %s219_s20 = smov 128   ;;  %s220_s21 = smov 8  }
   0x5   :  { %23 = dma.hbm_to_vmem [thread:$0]  %s16_s14, 256, %s18_s16, [#allocation3], %s219_s20, %s219_s20, %s220_s21  }
   0x6   :  { %s221_s22 = smov [#allocation5]  }
   0x7   :  { %s30_s23 = sshll.u32 %s221_s22, 4  ;;  %s31_s23 = int_to_ptr.vmem [resolvable:$true] %s30_s23 }
   0x8   :  { %36 = dma.hbm_to_vmem [thread:$0]  %s29_s19, 1024, %s31_s23, [#allocation6], %s219_s20, %s219_s20, %s220_s21  }
   0x9   :  { %212 = dma.done.wait [#allocation3], 256  }
   0xa   :  { %213 = vsyncadd [#allocation3], 4294967040 }
   0xb   :  { %214 = dma.done.wait [#allocation6], 1024  }
   0xc   :  { %215 = vsyncadd [#allocation6], 4294966272  ;;  %v69_v0 = vld [vmem:[#allocation5 + $0x38] sm:$0xff]  ;;  %v68_v1 = vld [vmem:[#allocation5 + $0x30] sm:$0xff]  ;;  %vm70_vm0 = vcmask 523264   ;;  %s222_s24 = smov [#allocation7]  }
   0xd   :  { %85 = vmatpush.msra.mxu0 %v69_v0  ;;  %126 = vmatpush.msra.mxu1 %v69_v0  ;;  %v67_v2 = vld [vmem:[#allocation5 + $0x28] sm:$0xff]  ;;  %v66_v3 = vld [vmem:[#allocation5 + $0x20] sm:$0xff]  ;;  %v65_v4 = vld [vmem:[#allocation5 + $0x18] sm:$0xff]  ;;  %s108_s25 = sshll.u32 %s222_s24, 4  ;;  %s110_s28 = sshll.u32 %s267_s3, 4  ;;  %s109_s25 = int_to_ptr.vmem [resolvable:$true] %s108_s25  ;;  %s111_s28 = int_to_ptr.hbm [resolvable:$true] %s110_s28 }
   0xe   :  { %v64_v5 = vld [vmem:[#allocation5 + $0x10] sm:$0xff]  ;;  %v63_v6 = vld [vmem:[#allocation5 + $0x8] sm:$0xff]  ;;  %v62_v7 = vld [vmem:[#allocation5] sm:$0xff] }
   0xf   :  { %86 = vmatpush.msra.mxu0 %v68_v1  ;;  %127 = vmatpush.msra.mxu1 %v68_v1  ;;  %v60_v8 = vld [vmem:[#allocation2] sm:$0xff]  ;;  %v61_v9 = vld [vmem:[#allocation2 + $0x8] sm:$0xff] }
  0x10   :  { %v139_v10 = vld [vmem:[%s266_s2] ss:$0 sm:$0xff] }
  0x11   :  { %87 = vmatpush.msra.mxu0 %v67_v2  ;;  %128 = vmatpush.msra.mxu1 %v67_v2 }
  0x13   :  { %88 = vmatpush.msra.mxu0 %v66_v3  ;;  %129 = vmatpush.msra.mxu1 %v66_v3 }
  0x15   :  { %89 = vmatpush.msra.mxu0 %v65_v4  ;;  %130 = vmatpush.msra.mxu1 %v65_v4 }
  0x17   :  { %90 = vmatpush.msra.mxu0 %v64_v5  ;;  %131 = vmatpush.msra.mxu1 %v64_v5 }
  0x19   :  { %91 = vmatpush.msra.mxu0 %v63_v6  ;;  %132 = vmatpush.msra.mxu1 %v63_v6 }
  0x1b   :  { %92 = vmatpush.msra.mxu0 %v62_v7  ;;  %133 = vmatpush.msra.mxu1 %v62_v7 }
  0x1c   :  { %124 = vmatmul.msk.f32.vlgmr.msra.gmra.mxu0 %vm70_vm0, %v60_v8  ;;  %125 = vmatmul.msk.f32.vlgmr.msra.gmra.mxu1 %vm70_vm0, %v61_v9 }
  0x99   :  { %v94_v11 = vpop.f32.mrf.mxu0  ;;  %v97_v12 = vpop.f32.mrf.mxu1 }
  0x9a   :  { %v100_v13 = vadd.f32 %v139_v10, %v94_v11  ;;  %v101_v14 = vadd.f32 %v139_v10, %v97_v12 }
  0x9c   :  { %102 = vst [vmem:[#allocation7] sm:$0xff] %v100_v13 }
  0x9d   :  { %103 = vst [vmem:[#allocation7 + $0x8] sm:$0xff] %v101_v14 }
  0x9e   :  { %116 = dma.vmem_to_hbm [thread:$0]  %s109_s25, 256, %s111_s28, [#allocation4], %s219_s20, %s219_s20, %s220_s21  }
  0x9f   :  { %216 = dma.done.wait [#allocation4], 256  }
  0xa0   :  { %217 = vsyncadd [#allocation4], 4294967040 }
  0xa1   :  { %121 = vsyncpa [#allocation3], 1 }
  0xa2   :  { %122 = vsyncpa [#allocation6], 1 }
  0xa3   :  { %123 = vsyncpa [#allocation4], 1 }

</bundles_post_ra>
